<compile_context>
chip_gen: v6e
topology: v6e:2x2x1
jax: 0.10.0
libtpu: 0.0.40
codegen_flags: <defaults>
</compile_context>

<pallas_src>
import functools

import jax
import jax.numpy as jnp
from jax.experimental import pallas as pl
from jax.experimental.pallas import tpu as pltpu


def _round_up(x, m):
    return ((x + m - 1) // m) * m


def _round_down(x, m):
    return (x // m) * m


def _cdiv(a, b):
    return (a + b - 1) // b


def _physical_vmem_bytes():
    """Per-TensorCore VMEM capacity; conservative 64 MiB (v7x) if unknown."""
    try:
        cap = int(getattr(pltpu.get_tpu_info(), "vmem_capacity_bytes", 0) or 0)
        if 0 < cap <= (256 << 20):
            return cap
    except Exception:
        pass
    try:
        kind = jax.devices()[0].device_kind.lower()
        if "v5" in kind or "v6" in kind:
            return 128 << 20
    except Exception:
        pass
    return 64 << 20


def _rmsnorm_kernel(x_ref, w_ref, o_ref, *, eps, inv_hidden):
    # x_ref: (row_tile, hidden) block in VMEM
    # w_ref: (1, hidden) block in VMEM (constant index_map -> resident, 1 DMA)
    x = x_ref[...].astype(jnp.float32)
    # sum * (1/hidden): constant multiply instead of a per-row divide.
    ssq = jnp.sum(x * x, axis=-1, keepdims=True)           # XLU lane reduce
    inv = jax.lax.rsqrt(ssq * inv_hidden + eps)             # EUP rsqrt (free slot)
    # Re-read x_ref for the scaling pass so the full f32 upcast of the block
    # doesn't have to stay live across the reduction (VMEM-friendly on v7x).
    xs = x_ref[...].astype(jnp.float32)
    o_ref[...] = (w_ref[...] * (xs * inv)).astype(o_ref.dtype)


def int8_llama_rmsnorm(hidden_states, weight, eps=1e-6, *, row_tile=None,
                       out_dtype=jnp.float32, input_buffer_count=2):
    """hidden_states: (..., hidden) f32/bf16; weight: (hidden,) f32.

    row_tile is a tuning knob; if None it is sized from the per-chip VMEM
    budget (double-buffered in+out blocks + f32 temporaries), 32-row aligned,
    while keeping >= 2 grid steps for megacore sharding when rows allow it.
    """
    orig_shape = hidden_states.shape
    hidden = orig_shape[-1]
    x2d = hidden_states.reshape(-1, hidden)
    rows = x2d.shape[0]
    w2d = weight.reshape(1, hidden).astype(jnp.float32)

    in_itemsize = jnp.dtype(x2d.dtype).itemsize
    out_itemsize = jnp.dtype(out_dtype).itemsize

    # Per-chip scoped-VMEM ceiling: 64 MiB chips (v7x) keep ~8 MiB headroom;
    # 128 MiB chips (v5e/v6e) are allowed up to ~100 MiB so tiles get large
    # enough to amortize the ~0.35 us per-grid-step overhead.
    vmem_cap = _physical_vmem_bytes()
    if vmem_cap <= (64 << 20):
        vmem_limit_max = vmem_cap - (8 << 20)
    else:
        vmem_limit_max = min(vmem_cap - (16 << 20), 100 << 20)

    weight_bytes = 2 * hidden * 4                       # weight (budget 2 copies)
    in_row = hidden * in_itemsize
    out_row = hidden * out_itemsize
    temp_row = 2 * hidden * 4                           # f32 upcast/product temps
    per_row = 2 * (in_row + out_row) + temp_row         # double-buffered in/out + temps

    if row_tile is None:
        block_budget = max(per_row, vmem_limit_max - weight_bytes - (4 << 20))
        rt = max(32, _round_down(block_budget // per_row, 32))
        rt = min(rt, _round_up(rows, 32))               # don't dwarf the problem
        # Keep >= 2 (ideally >= 4) grid steps so the "parallel" axis shards
        # across both TensorCores on v7x and the DMA pipeline stays fed.
        if rows >= 4 * 32:
            min_steps = 4
        elif rows >= 2 * 32:
            min_steps = 2
        else:
            min_steps = 1
        if min_steps > 1:
            rt = min(rt, max(32, _round_down(_cdiv(rows, min_steps), 32)))
        row_tile = int(rt)

    grid = (_cdiv(rows, row_tile),)                     # ragged last block masked by Pallas

    # Scoped VMEM: actual footprint + headroom, clamped to the per-chip ceiling.
    in_block = row_tile * in_row
    out_block = row_tile * out_row
    needed = 2 * (in_block + out_block) + row_tile * temp_row + weight_bytes + (4 << 20)
    vmem_limit = int(min(vmem_limit_max, max(needed, 32 << 20)))

    in_spec_kwargs = {}
    if input_buffer_count and input_buffer_count > 2:
        # Deeper input pipelining if profiling shows exposed DMA (v7x-sized tiles).
        in_spec_kwargs["pipeline_mode"] = pl.Buffered(int(input_buffer_count))

    out = pl.pallas_call(
        functools.partial(_rmsnorm_kernel, eps=eps, inv_hidden=1.0 / hidden),
        out_shape=jax.ShapeDtypeStruct((rows, hidden), out_dtype),
        grid_spec=pltpu.PrefetchScalarGridSpec(
            num_scalar_prefetch=0,
            grid=grid,
            in_specs=[
                pl.BlockSpec((row_tile, hidden), lambda i: (i, 0), **in_spec_kwargs),
                pl.BlockSpec((1, hidden), lambda i: (0, 0)),
            ],
            out_specs=pl.BlockSpec((row_tile, hidden), lambda i: (i, 0)),
        ),
        compiler_params=pltpu.CompilerParams(
            dimension_semantics=("parallel",),
            vmem_limit_bytes=vmem_limit),
    )(x2d, w2d)

    return out.reshape(orig_shape[:-1] + (hidden,))


def _reference(hidden_states, weight, eps):
    x32 = hidden_states.astype(jnp.float32)
    var = jnp.mean(x32 * x32, axis=-1, keepdims=True)
    return weight.astype(jnp.float32) * (x32 * jax.lax.rsqrt(var + eps))


if __name__ == "__main__":
    eps = 1e-6
    key = jax.random.PRNGKey(0)
    k1, k2, k3 = jax.random.split(key, 3)

    batch, seq, hidden = 2, 8, 128
    # Deterministic parameter matching module __init__: weight = ones(hidden), fp32.
    weight = jnp.ones((hidden,), dtype=jnp.float32)

    # --- Test 1: small Llama-like shape, auto-sized tile ---
    hs1 = jax.random.normal(k1, (batch, seq, hidden), dtype=jnp.float32)
    out1 = jax.block_until_ready(int8_llama_rmsnorm(hs1, weight, eps))
    ref1 = _reference(hs1, weight, eps)
    assert out1.shape == ref1.shape and out1.dtype == jnp.float32
    assert jnp.allclose(out1, ref1, atol=1e-5, rtol=1e-5)

    # --- Test 2: ragged rows (rows % row_tile != 0) -> masked last block path ---
    hs2 = jax.random.normal(k2, (3, 5, hidden), dtype=jnp.float32)   # 15 rows
    out2 = jax.block_until_ready(int8_llama_rmsnorm(hs2, weight, eps, row_tile=8))
    ref2 = _reference(hs2, weight, eps)
    assert jnp.allclose(out2, ref2, atol=1e-5, rtol=1e-5)

    # --- Test 3: bf16 input -> f32 output (upcast + re-read path) ---
    hs3 = jax.random.normal(k3, (batch, seq, hidden), dtype=jnp.float32).astype(jnp.bfloat16)
    out3 = jax.block_until_ready(int8_llama_rmsnorm(hs3, weight, eps))
    ref3 = _reference(hs3, weight, eps)
    assert out3.dtype == jnp.float32
    assert jnp.allclose(out3, ref3, atol=1e-4, rtol=1e-4)

    print("KERNEL_OK")
</pallas_src>

<mosaic_0001>
module attributes {stable_mosaic.version = 11 : i64} {
  func.func @_rmsnorm_kernel(%arg0: i32, %arg1: memref<32x128xf32, #tpu.memory_space<vmem>>, %arg2: memref<1x128xf32, #tpu.memory_space<vmem>>, %arg3: memref<32x128xf32, #tpu.memory_space<vmem>>) attributes {dimension_semantics = [#tpu.dimension_semantics<parallel>], iteration_bounds = array<i64: 1>, scalar_prefetch = 0 : i64, scratch_operands = 0 : i64, tpu.core_type = #tpu.core_type<tc>, window_params = [{transform_indices = @transform_0, window_bounds = array<i64: 32, 128>}, {pipeline_mode = #tpu.pipeline_mode<synchronous>, transform_indices = @transform_1, window_bounds = array<i64: 1, 128>}, {transform_indices = @transform_2, window_bounds = array<i64: 32, 128>}]} {
    %c0 = arith.constant 0 : index
    %c0_0 = arith.constant 0 : index
    %0 = vector.load %arg1[%c0, %c0_0] : memref<32x128xf32, #tpu.memory_space<vmem>>, vector<32x128xf32>
    %1 = arith.mulf %0, %0 : vector<32x128xf32>
    %cst = arith.constant dense<0.000000e+00> : vector<32xf32>
    %2 = vector.multi_reduction <add>, %1, %cst [1] : vector<32x128xf32> to vector<32xf32>
    %3 = vector.shape_cast %2 : vector<32xf32> to vector<32x1xf32>
    %cst_1 = arith.constant 7.812500e-03 : f32
    %4 = vector.broadcast %cst_1 : f32 to vector<32x1xf32>
    %5 = arith.mulf %3, %4 : vector<32x1xf32>
    %cst_2 = arith.constant 9.99999997E-7 : f32
    %6 = vector.broadcast %cst_2 : f32 to vector<32x1xf32>
    %7 = arith.addf %5, %6 : vector<32x1xf32>
    %8 = math.rsqrt %7 : vector<32x1xf32>
    %c0_3 = arith.constant 0 : index
    %c0_4 = arith.constant 0 : index
    %9 = vector.load %arg1[%c0_3, %c0_4] : memref<32x128xf32, #tpu.memory_space<vmem>>, vector<32x128xf32>
    %c0_5 = arith.constant 0 : index
    %c0_6 = arith.constant 0 : index
    %10 = vector.load %arg2[%c0_5, %c0_6] : memref<1x128xf32, #tpu.memory_space<vmem>>, vector<1x128xf32>
    %11 = vector.broadcast %8 : vector<32x1xf32> to vector<32x128xf32>
    %12 = arith.mulf %9, %11 : vector<32x128xf32>
    %13 = vector.broadcast %10 : vector<1x128xf32> to vector<32x128xf32>
    %14 = arith.mulf %13, %12 : vector<32x128xf32>
    %c0_7 = arith.constant 0 : index
    %c0_8 = arith.constant 0 : index
    %15 = vector.load %arg3[%c0_7, %c0_8] : memref<32x128xf32, #tpu.memory_space<vmem>>, vector<32x128xf32>
    tpu.vector_store %arg3[%c0_7, %c0_8], %14 {strides = array<i32>} : memref<32x128xf32, #tpu.memory_space<vmem>>, vector<32x128xf32>,
    return
  }
  func.func @transform_0(%arg0: i32) -> (i32, i32) {
    %c0_i32 = arith.constant 0 : i32
    %c0_i32_0 = arith.constant 0 : i32
    return %arg0, %c0_i32 : i32, i32
  }
  func.func @transform_1(%arg0: i32) -> (i32, i32) {
    %c0_i32 = arith.constant 0 : i32
    %c0_i32_0 = arith.constant 0 : i32
    %c0_i32_1 = arith.constant 0 : i32
    return %c0_i32, %c0_i32_0 : i32, i32
  }
  func.func @transform_2(%arg0: i32) -> (i32, i32) {
    %c0_i32 = arith.constant 0 : i32
    %c0_i32_0 = arith.constant 0 : i32
    return %arg0, %c0_i32 : i32, i32
  }
}

</mosaic_0001>

<bundles_post_ra>
// kernel: tpu_custom_call.1
= control target key start
LH: loop header
LB: loop body
LE: loop exit
PB: predicated region body
PF: predicated region fallthrough
CT: control target
= control target key end

     0   :  { %7 = vsyncpa [#allocation3], 0  ;;  %s181_s0 = inlined_call_operand.hbm [shape: f32[16,128], index: 0, kind: input, shape index: {}]   ;;  %s182_s1 = inlined_call_operand.vmem [shape: f32[1,128], index: 1, kind: input, shape index: {}]   ;;  %s183_s2 = inlined_call_operand.hbm [shape: f32[16,128], index: 2, kind: output, shape index: {}]  }
   0x1   :  { %8 = vsyncpa [#allocation4], 0 }
   0x2   :  { %13 = vsyncadd [#allocation3], 256  ;;  %s147_s9 = smov [#allocation2]  }
   0x3   :  { %s14_s10 = sshll.u32 %s147_s9, 4  ;;  %s15_s10 = int_to_ptr.vmem [resolvable:$true] %s14_s10 }
   0x4   :  { %s111_s11 = scalar_lea.vmem %s15_s10, 256  ;;  %s115_s12 = scalar_lea.vmem %s15_s10, 512 }
   0x5   :  { %p112_p0 = scmp.ne.s32.totalorder %s15_s10, %s111_s11  ;;  %p116_p1 = scmp.lt.s32.totalorder %s15_s10, %s15_s10 }
   0x6   :  { %p117_p2 = scmp.lt.s32.totalorder %s115_s12, %s111_s11 }
   0x8   :  { %p118_p3 = por %p117_p2, %p116_p1 }
   0xa   :  { %p119_p4 = pnand %p118_p3, %p112_p0 }
   0xc   :  { %122 = shalt.err (!%p119_p4)
}
   0xd   :  { %s148_s13 = smov 128   ;;  %s149_s14 = smov 8  }
   0xe   :  { %20 = dma.hbm_to_vmem [thread:$0]  %s181_s0, 256, %s15_s10, [#allocation3], %s148_s13, %s148_s13, %s149_s14  }
   0xf   :  { %143 = dma.done.wait [#allocation3], 512  }
  0x10   :  { %144 = vsyncadd [#allocation3], 4294966784  ;;  %v28_v0 = vld [vmem:[#allocation2 + $0x10] sm:$0xff]  ;;  %v26_v1 = vld [vmem:[#allocation2] sm:$0xff] }
  0x11   :  { %v29_v2 = vld [vmem:[#allocation2 + $0x18] sm:$0xff]  ;;  %v32_v3 = vmul.f32 %v28_v0, %v28_v0  ;;  %v30_v4 = vmul.f32 %v26_v1, %v26_v1  ;;  %v27_v5 = vld [vmem:[#allocation2 + $0x8] sm:$0xff]  ;;  %v90_v21 = vld [vmem:[%s182_s1] ss:$0 sm:$0xff] }
  0x12   :  { %v33_v6 = vmul.f32 %v29_v2, %v29_v2  ;;  %v31_v7 = vmul.f32 %v27_v5, %v27_v5 }
  0x13   :  { %38 = vadd.xlane.f32.xlu1 %v32_v3  ;;  %34 = vadd.xlane.f32.xlu0 %v30_v4 }
  0x17   :  { %40 = vadd.xlane.f32.xlu1 %v33_v6  ;;  %36 = vadd.xlane.f32.xlu0 %v31_v7 }
  0x9c   :  { %v39_v8 = vpop.xlane.xlu1 %38  ;;  %v35_v9 = vpop.xlane.xlu0 %34 }
  0x9d   :  { %v44_v10 = vmul.f32 0.0078125, %v39_v8  ;;  %v42_v11 = vmul.f32 0.0078125, %v35_v9 }
  0x9f   :  { %v48_v12 = vadd.f32 1e-06, %v44_v10  ;;  %v46_v13 = vadd.f32 1e-06, %v42_v11 }
  0xa0   :  { %v41_v14 = vpop.xlane.xlu1 %40  ;;  %v37_v15 = vpop.xlane.xlu0 %36 }
  0xa1   :  { %95 = vrsqrt.f32 %v48_v12  ;;  %v45_v16 = vmul.f32 0.0078125, %v41_v14  ;;  %v43_v17 = vmul.f32 0.0078125, %v37_v15 }
  0xa2   :  { %97 = vrsqrt.f32 %v46_v13 }
  0xa3   :  { %v49_v18 = vadd.f32 1e-06, %v45_v16  ;;  %v47_v19 = vadd.f32 1e-06, %v43_v17 }
  0xa5   :  { %99 = vrsqrt.f32 %v49_v18 }
  0xa6   :  { %101 = vrsqrt.f32 %v47_v19 }
  0xae   :  { %v96_v20 = vpop.eup %95 }
  0xaf   :  { %v98_v22 = vpop.eup %97  ;;  %v57_v23 = vmul.f32 %v96_v20, %v28_v0 }
  0xb0   :  { %v55_v24 = vmul.f32 %v98_v22, %v26_v1 }
  0xb1   :  { %v67_v25 = vmul.f32 %v90_v21, %v57_v23 }
  0xb2   :  { %v100_v26 = vpop.eup %99  ;;  %v65_v27 = vmul.f32 %v90_v21, %v55_v24 }
  0xb3   :  { %v102_v28 = vpop.eup %101  ;;  %71 = vst [vmem:[#allocation5 + $0x10] sm:$0xff] %v67_v25  ;;  %v58_v29 = vmul.f32 %v100_v26, %v29_v2 }
  0xb4   :  { %69 = vst [vmem:[#allocation5] sm:$0xff] %v65_v27  ;;  %v56_v30 = vmul.f32 %v102_v28, %v27_v5 }
  0xb5   :  { %v68_v31 = vmul.f32 %v90_v21, %v58_v29 }
  0xb6   :  { %v66_v32 = vmul.f32 %v90_v21, %v56_v30 }
  0xb7   :  { %72 = vst [vmem:[#allocation5 + $0x18] sm:$0xff] %v68_v31 }
  0xb8   :  { %70 = vst [vmem:[#allocation5 + $0x8] sm:$0xff] %v66_v32 }
  0xb9   :  { %77 = vsyncadd [#allocation4], 256  ;;  %s150_s18 = smov [#allocation5]  }
  0xba   :  { %s78_s19 = sshll.u32 %s150_s18, 4  ;;  %s79_s19 = int_to_ptr.vmem [resolvable:$true] %s78_s19 }
  0xbb   :  { %s123_s1 = scalar_lea.vmem %s79_s19, 256  ;;  %s127_s20 = scalar_lea.vmem %s79_s19, 512 }
  0xbc   :  { %p124_p5 = scmp.ne.s32.totalorder %s79_s19, %s123_s1  ;;  %p128_p6 = scmp.lt.s32.totalorder %s79_s19, %s79_s19 }
  0xbd   :  { %p129_p7 = scmp.lt.s32.totalorder %s127_s20, %s123_s1 }
  0xbf   :  { %p130_p8 = por %p129_p7, %p128_p6 }
  0xc1   :  { %p131_p9 = pnand %p130_p8, %p124_p5 }
  0xc3   :  { %134 = shalt.err (!%p131_p9)
}
  0xc4   :  { %84 = dma.vmem_to_hbm [thread:$0]  %s79_s19, 256, %s183_s2, [#allocation4], %s148_s13, %s148_s13, %s149_s14  }
  0xc5   :  { %145 = dma.done.wait [#allocation4], 512  }
  0xc6   :  { %146 = vsyncadd [#allocation4], 4294966784 }
  0xc7   :  { %88 = vsyncpa [#allocation3], 1 }
  0xc8   :  { %89 = vsyncpa [#allocation4], 1 }

</bundles_post_ra>
